<compile_context>
chip_gen: v6e
topology: v6e:2x2x1
jax: 0.10.0
libtpu: 0.0.40
codegen_flags: <defaults>
</compile_context>

<pallas_src>
import functools

import jax
import jax.numpy as jnp
import numpy as np
from jax.experimental import pallas as pl
from jax.experimental.pallas import tpu as pltpu


# --------------------------------------------------------------------------
# Helpers
# --------------------------------------------------------------------------
def _round_up(x, m):
    return (x + m - 1) // m * m


def _pick_tile(total, max_tile, quantum):
    """Largest multiple of `quantum` <= max_tile that divides `total`
    (`total` must itself be a multiple of `quantum`)."""
    t = min(max_tile, total)
    t = max((t // quantum) * quantum, quantum)
    while total % t:
        t -= quantum
    return t


def _gen_config():
    """Per-generation MXU dtype / row-tile cap / VMEM request cap."""
    try:
        kind = jax.devices()[0].device_kind.lower()
    except Exception:
        kind = ""
    if "v7" in kind:
        # 64 MiB physical VMEM per TensorCore: leave headroom, no int8 MXU.
        return dict(mxu_dtype=jnp.bfloat16, tm_cap=256, vmem_cap=48 * 2**20)
    if "v6" in kind:
        # 128 MiB VMEM; needs big tm to cross the weight-stream roofline.
        return dict(mxu_dtype=jnp.int8, tm_cap=512, vmem_cap=100 * 2**20)
    if "v5" in kind:
        # Already compute-bound at tm=256; only ask for what the tiles need.
        return dict(mxu_dtype=jnp.int8, tm_cap=256, vmem_cap=80 * 2**20)
    # Unknown / older generation: conservative, bf16 MXU operands, default VMEM.
    return dict(mxu_dtype=jnp.bfloat16, tm_cap=256, vmem_cap=None)


def _quant_vmem_bytes(tm, K, x_bytes, xq_bytes):
    return 2 * tm * K * x_bytes + 2 * tm * K * xq_bytes + 2 * tm * 128 * 4


def _matmul_vmem_bytes(tm, tn, tk, n_pad, xq_bytes, out_bytes, blocked, wbuf):
    b = 2 * tm * tk * xq_bytes          # quantized activation tiles (x2 buffers)
    b += wbuf * tk * tn                 # int8 weight tiles (2- or 3-deep)
    b += 2 * tm * tn * out_bytes        # output tiles
    b += 2 * 2 * 8 * n_pad * 4          # resident col-scale + bias rows
    b += 2 * tm * 128 * 4               # per-token row-scale column
    if blocked:
        b += tm * tn * 4                # accumulator scratch
    return b


def _vmem_limit(vmem_cap, est_bytes):
    if vmem_cap is None:
        return None
    return int(min(vmem_cap, max(2 * est_bytes + (4 << 20), 32 << 20)))


# --------------------------------------------------------------------------
# Pass 1: activation quantization
# --------------------------------------------------------------------------
def _quantize_kernel(x_ref, xq_ref, rs_ref, *, per_token, mxu_dtype):
    x = x_ref[...].astype(jnp.float32)
    if per_token:
        absmax = jnp.maximum(jnp.max(jnp.abs(x), axis=-1, keepdims=True), 1e-8)
        inv = 127.0 / absmax                         # one divide per row
        xq = jnp.clip(jnp.round(x * inv), -128.0, 127.0)
        rs_ref[...] = absmax / 127.0
    else:
        xq = jnp.clip(jnp.round(x), -128.0, 127.0)
        rs_ref[...] = jnp.ones(rs_ref.shape, jnp.float32)
    xq_ref[...] = xq.astype(mxu_dtype)


def _quantize_acts(x2, per_token, mxu_dtype, tm_hint, vmem_cap):
    m_pad, K = x2.shape
    x_bytes = jnp.dtype(x2.dtype).itemsize
    xq_bytes = jnp.dtype(mxu_dtype).itemsize
    budget = int(0.85 * (vmem_cap if vmem_cap is not None else 16 * 2**20))

    tmq = tm_hint
    while tmq > 32 and _quant_vmem_bytes(tmq, K, x_bytes, xq_bytes) > budget:
        tmq = _pick_tile(m_pad, tmq - 32, 32)

    est = _quant_vmem_bytes(tmq, K, x_bytes, xq_bytes)
    kernel = functools.partial(_quantize_kernel, per_token=per_token,
                               mxu_dtype=mxu_dtype)
    return pl.pallas_call(
        kernel,
        out_shape=(jax.ShapeDtypeStruct((m_pad, K), mxu_dtype),
                   jax.ShapeDtypeStruct((m_pad, 1), jnp.float32)),
        grid_spec=pltpu.PrefetchScalarGridSpec(
            num_scalar_prefetch=0,
            grid=(m_pad // tmq,),
            in_specs=[pl.BlockSpec((tmq, K), lambda i: (i, 0))],
            out_specs=(pl.BlockSpec((tmq, K), lambda i: (i, 0)),
                       pl.BlockSpec((tmq, 1), lambda i: (i, 0))),
        ),
        compiler_params=pltpu.CompilerParams(
            dimension_semantics=("parallel",),
            vmem_limit_bytes=_vmem_limit(vmem_cap, est),
        ),
    )(x2)


# --------------------------------------------------------------------------
# Pass 2: int8 GEMM + q/k/v dequant + bias
# --------------------------------------------------------------------------
def _qkv_matmul_kernel(xq_ref, wt_ref, scale_ref, bias_ref, rs_ref, o_ref,
                       *scratch, per_token, mxu_dtype, tn, k_blocked):
    j = pl.program_id(1)
    col = pl.multiple_of(j * tn, 128)

    xq = xq_ref[...]
    w = wt_ref[...]
    if jnp.dtype(mxu_dtype) == jnp.dtype(jnp.int8):
        part = jnp.dot(xq, w, preferred_element_type=jnp.int32)      # exact
    else:
        # bf16 operands (|v| <= 127 exact), f32 accumulation on the MXU.
        part = jnp.dot(xq, w.astype(mxu_dtype),
                       preferred_element_type=jnp.float32)

    def epilogue(acc):
        accf = acc.astype(jnp.float32)
        sc = scale_ref[:, pl.ds(col, tn)]                 # (1, tn), resident
        b = bias_ref[:, pl.ds(col, tn)]                   # (1, tn), resident
        dq = rs_ref[...] * sc if per_token else sc        # (tm,1)*(1,tn)
        o_ref[...] = (accf * dq + b).astype(o_ref.dtype)

    if k_blocked:
        acc_ref = scratch[0]
        k = pl.program_id(2)

        @pl.when(k == 0)
        def _init():
            acc_ref[...] = jnp.zeros_like(acc_ref)

        acc_ref[...] += part

        @pl.when(k == pl.num_programs(2) - 1)
        def _finalize():
            epilogue(acc_ref[...])
    else:
        epilogue(part)


# --------------------------------------------------------------------------
# Weight-load-time prep + forward wrapper
# --------------------------------------------------------------------------
def prepare_qkv_params(weight_int8, q_scale, k_scale, v_scale, bias, qkv_size):
    """One-time prep: transpose weight, expand q/k/v scales per output column,
    build a bias row, and pad N to a multiple of 256 lanes (so the column tile
    never degrades below 256)."""
    N, K = weight_int8.shape
    assert N == 3 * qkv_size
    w_t = jnp.asarray(weight_int8).T                               # (K, N) int8
    col_scale = jnp.concatenate([
        jnp.full((qkv_size,), q_scale, dtype=jnp.float32),
        jnp.full((qkv_size,), k_scale, dtype=jnp.float32),
        jnp.full((qkv_size,), v_scale, dtype=jnp.float32),
    ]).reshape(1, N)
    if bias is None:
        bias_row = jnp.zeros((1, N), dtype=jnp.float32)
    else:
        bias_row = jnp.asarray(bias, dtype=jnp.float32).reshape(1, N)

    n_pad = _round_up(N, 256)
    if n_pad != N:
        w_t = jnp.pad(w_t, ((0, 0), (0, n_pad - N)))
        col_scale = jnp.pad(col_scale, ((0, 0), (0, n_pad - N)))
        bias_row = jnp.pad(bias_row, ((0, 0), (0, n_pad - N)))
    return w_t, col_scale, bias_row, N


def w8a8_qkv_linear(x, w_t, col_scale, bias_row, n_valid,
                    act_quant="per-tensor", mxu_dtype=None,
                    tm=None, tn=512, tk=None):
    """JAX/Pallas equivalent of W8A8BFP32OFP32QKVLinear.forward."""
    assert act_quant in ("per-token", "per-tensor")
    cfg = _gen_config()
    if mxu_dtype is None:
        mxu_dtype = cfg["mxu_dtype"]
    tm_cap = tm if tm is not None else cfg["tm_cap"]
    vmem_cap = cfg["vmem_cap"]
    per_token = act_quant == "per-token"

    x_shape = x.shape
    out_dtype = x.dtype
    K, n_pad = w_t.shape

    x2 = x.reshape(-1, x_shape[-1])
    M = x2.shape[0]
    assert x2.shape[1] == K

    # Minimal row padding: pad to the 32-row quantum only, then tile with a
    # divisor of the padded extent (<=32 wasted rows regardless of M).
    m_pad = _round_up(M, 32)
    if m_pad != M:
        x2 = jnp.pad(x2, ((0, m_pad - M), (0, 0)))
    tm_eff = _pick_tile(m_pad, max(tm_cap, 32), 32)

    # Lane-dense column tile (>=256 thanks to N padding in prepare_qkv_params).
    quantum_n = 256 if n_pad % 256 == 0 else 128
    tn_eff = _pick_tile(n_pad, tn, quantum_n)

    xq_bytes = jnp.dtype(mxu_dtype).itemsize
    out_bytes = jnp.dtype(out_dtype).itemsize

    # ---- pass 1: quantize activations (int8/bf16 + per-row scale) -----------
    xq, rs = _quantize_acts(x2, per_token, mxu_dtype, tm_eff, vmem_cap)

    # ---- pass 2: GEMM + dequant + bias --------------------------------------
    budget = int(0.85 * (vmem_cap if vmem_cap is not None else 16 * 2**20))
    wbuf = 3 if tm_eff <= 64 else 2                  # deeper weight pipeline for decode

    if tk is None:
        tk_eff, blocked = K, False
        if (K % 128 == 0 and K > 128 and
                _matmul_vmem_bytes(tm_eff, tn_eff, K, n_pad, xq_bytes,
                                   out_bytes, False, wbuf) > budget):
            blocked, tk_eff = True, 128
            for mult in range(K // 128 - 1, 0, -1):
                cand = mult * 128
                if K % cand == 0 and _matmul_vmem_bytes(
                        tm_eff, tn_eff, cand, n_pad, xq_bytes,
                        out_bytes, True, wbuf) <= budget:
                    tk_eff = cand
                    break
    else:
        tk_eff = min(tk, K)
        assert K % tk_eff == 0, "tk must divide in_features"
        blocked = tk_eff < K

    est = _matmul_vmem_bytes(tm_eff, tn_eff, tk_eff, n_pad, xq_bytes,
                             out_bytes, blocked, wbuf)

    acc_dtype = jnp.int32 if jnp.dtype(mxu_dtype) == jnp.dtype(jnp.int8) else jnp.float32
    scratch = [pltpu.VMEM((tm_eff, tn_eff), acc_dtype)] if blocked else []

    w_map = lambda i, j, k: (k, j)
    w_spec = pl.BlockSpec((tk_eff, tn_eff), w_map)
    if wbuf == 3 and hasattr(pl, "Buffered"):
        try:
            w_spec = pl.BlockSpec((tk_eff, tn_eff), w_map,
                                  pipeline_mode=pl.Buffered(3))
        except TypeError:
            pass  # older API: fall back to default double buffering

    kernel = functools.partial(_qkv_matmul_kernel, per_token=per_token,
                               mxu_dtype=mxu_dtype, tn=tn_eff, k_blocked=blocked)

    out = pl.pallas_call(
        kernel,
        out_shape=jax.ShapeDtypeStruct((m_pad, n_pad), out_dtype),
        grid_spec=pltpu.PrefetchScalarGridSpec(
            num_scalar_prefetch=0,
            grid=(m_pad // tm_eff, n_pad // tn_eff, K // tk_eff),
            in_specs=[
                pl.BlockSpec((tm_eff, tk_eff), lambda i, j, k: (i, k)),  # xq
                w_spec,                                                  # weight^T
                pl.BlockSpec((1, n_pad), lambda i, j, k: (0, 0)),        # col scales (resident)
                pl.BlockSpec((1, n_pad), lambda i, j, k: (0, 0)),        # bias row (resident)
                pl.BlockSpec((tm_eff, 1), lambda i, j, k: (i, 0)),       # per-row scale
            ],
            out_specs=pl.BlockSpec((tm_eff, tn_eff), lambda i, j, k: (i, j)),
            scratch_shapes=scratch,
        ),
        compiler_params=pltpu.CompilerParams(
            dimension_semantics=("parallel", "parallel", "arbitrary"),
            vmem_limit_bytes=_vmem_limit(vmem_cap, est),
        ),
    )(xq, w_t, col_scale, bias_row, rs)

    out = out[:M, :n_valid]
    return out.reshape(*x_shape[:-1], n_valid)


# --------------------------------------------------------------------------
# Pure-JAX reference (mirrors the torch forward; same quantization arithmetic)
# --------------------------------------------------------------------------
def _reference(x, weight_int8, q_scale, k_scale, v_scale, bias,
               qkv_size, act_quant):
    x_shape = x.shape
    dtype = x.dtype
    x2 = x.reshape(-1, x_shape[-1]).astype(jnp.float32)
    if act_quant == "per-token":
        absmax = jnp.maximum(jnp.max(jnp.abs(x2), axis=-1, keepdims=True), 1e-8)
        xq = jnp.clip(jnp.round(x2 * (127.0 / absmax)), -128, 127)
        qs = absmax / 127.0
        dq_q, dq_k, dq_v = qs * q_scale, qs * k_scale, qs * v_scale
    else:
        xq = jnp.clip(jnp.round(x2), -128, 127)
        dq_q, dq_k, dq_v = q_scale, k_scale, v_scale
    acc = jnp.dot(xq.astype(jnp.int32), weight_int8.T.astype(jnp.int32))
    q = acc[:, :qkv_size].astype(jnp.float32)
    k = acc[:, qkv_size:2 * qkv_size].astype(jnp.float32)
    v = acc[:, 2 * qkv_size:].astype(jnp.float32)
    q_dq, k_dq, v_dq = q * dq_q, k * dq_k, v * dq_v
    if bias is not None:
        q_dq = q_dq + bias[:qkv_size]
        k_dq = k_dq + bias[qkv_size:2 * qkv_size]
        v_dq = v_dq + bias[2 * qkv_size:]
    out = jnp.concatenate([q_dq, k_dq, v_dq], axis=-1)
    return out.reshape(*x_shape[:-1], -1).astype(dtype)


if __name__ == "__main__":
    batch, seq = 2, 8
    qkv_size = 128
    out_features = 3 * qkv_size          # 384 -> padded to 512 output lanes
    q_scale, k_scale, v_scale = 0.013, 0.011, 0.017

    key = jax.random.PRNGKey(0)
    kx, kw, kb = jax.random.split(key, 3)

    ok = True
    # Second config forces the K-blocked accumulator path (tk=128, K=256).
    for in_features, tk in ((128, None), (256, 128)):
        weight_int8 = jax.random.randint(
            kw, (out_features, in_features), -127, 128,
            dtype=jnp.int32).astype(jnp.int8)
        bias = 0.05 * jax.random.normal(kb, (out_features,), dtype=jnp.float32)
        x = 4.0 * jax.random.normal(kx, (batch, seq, in_features),
                                    dtype=jnp.float32)

        w_t, col_scale, bias_row, n_valid = prepare_qkv_params(
            weight_int8, q_scale, k_scale, v_scale, bias, qkv_size)

        for act_quant in ("per-tensor", "per-token"):
            out = w8a8_qkv_linear(x, w_t, col_scale, bias_row, n_valid,
                                  act_quant=act_quant, tk=tk)
            out = jax.block_until_ready(out)
            ref = _reference(x, weight_int8, q_scale, k_scale, v_scale, bias,
                             qkv_size, act_quant)
            if out.shape != (batch, seq, out_features) or out.dtype != x.dtype:
                ok = False
            if not np.allclose(np.asarray(out), np.asarray(ref),
                               rtol=1e-5, atol=1e-4):
                ok = False

    # TODO(synk): for extremely large K the quantization pre-pass still loads a
    # full (tm, K) activation row block; a two-sweep absmax would bound it.
    print("KERNEL_OK" if ok else "KERNEL_MISMATCH")
</pallas_src>

<mosaic_0001>
module attributes {stable_mosaic.version = 11 : i64} {
  func.func @_quantize_kernel(%arg0: i32, %arg1: memref<32x128xf32, #tpu.memory_space<vmem>>, %arg2: memref<32x128xbf16, #tpu.memory_space<vmem>>, %arg3: memref<32x1xf32, #tpu.memory_space<vmem>>) attributes {dimension_semantics = [#tpu.dimension_semantics<parallel>], iteration_bounds = array<i64: 1>, scalar_prefetch = 0 : i64, scratch_operands = 0 : i64, tpu.core_type = #tpu.core_type<tc>, window_params = [{transform_indices = @transform_0, window_bounds = array<i64: 32, 128>}, {transform_indices = @transform_1, window_bounds = array<i64: 32, 128>}, {transform_indices = @transform_2, window_bounds = array<i64: 32, 1>}]} {
    %c0 = arith.constant 0 : index
    %c0_0 = arith.constant 0 : index
    %0 = vector.load %arg1[%c0, %c0_0] : memref<32x128xf32, #tpu.memory_space<vmem>>, vector<32x128xf32>
    %1 = math.roundeven %0 : vector<32x128xf32>
    %cst = arith.constant -1.280000e+02 : f32
    %cst_1 = arith.constant 1.270000e+02 : f32
    %2 = vector.broadcast %cst : f32 to vector<32x128xf32>
    %3 = arith.maximumf %2, %1 : vector<32x128xf32>
    %4 = vector.broadcast %cst_1 : f32 to vector<32x128xf32>
    %5 = arith.minimumf %4, %3 : vector<32x128xf32>
    %cst_2 = arith.constant 1.000000e+00 : f32
    %6 = vector.broadcast %cst_2 : f32 to vector<32x1xf32>
    %c0_3 = arith.constant 0 : index
    %c0_4 = arith.constant 0 : index
    %7 = vector.load %arg3[%c0_3, %c0_4] : memref<32x1xf32, #tpu.memory_space<vmem>>, vector<32x1xf32>
    tpu.vector_store %arg3[%c0_3, %c0_4], %6 {strides = array<i32>} : memref<32x1xf32, #tpu.memory_space<vmem>>, vector<32x1xf32>,
    %8 = arith.truncf %5 : vector<32x128xf32> to vector<32x128xbf16>
    %c0_5 = arith.constant 0 : index
    %c0_6 = arith.constant 0 : index
    %9 = vector.load %arg2[%c0_5, %c0_6] : memref<32x128xbf16, #tpu.memory_space<vmem>>, vector<32x128xbf16>
    tpu.vector_store %arg2[%c0_5, %c0_6], %8 {strides = array<i32>} : memref<32x128xbf16, #tpu.memory_space<vmem>>, vector<32x128xbf16>,
    return
  }
  func.func @transform_0(%arg0: i32) -> (i32, i32) {
    %c0_i32 = arith.constant 0 : i32
    %c0_i32_0 = arith.constant 0 : i32
    return %arg0, %c0_i32 : i32, i32
  }
  func.func @transform_1(%arg0: i32) -> (i32, i32) {
    %c0_i32 = arith.constant 0 : i32
    %c0_i32_0 = arith.constant 0 : i32
    return %arg0, %c0_i32 : i32, i32
  }
  func.func @transform_2(%arg0: i32) -> (i32, i32) {
    %c0_i32 = arith.constant 0 : i32
    %c0_i32_0 = arith.constant 0 : i32
    return %arg0, %c0_i32 : i32, i32
  }
}

</mosaic_0001>

<bundles_post_ra>
// kernel: tpu_custom_call.1
= control target key start
LH: loop header
LB: loop body
LE: loop exit
PB: predicated region body
PF: predicated region fallthrough
CT: control target
= control target key end

     0   :  { %8 = vsyncpa [#allocation3], 0  ;;  %s241_s0 = inlined_call_operand.hbm [shape: f32[32,128], index: 0, kind: input, shape index: {}]   ;;  %s242_s1 = inlined_call_operand.hbm [shape: bf16[32,128], index: 1, kind: output, shape index: {0}]   ;;  %s243_s2 = inlined_call_operand.vmem [shape: f32[32,1], index: 2, kind: output, shape index: {1}]  }
   0x1   :  { %9 = vsyncpa [#allocation4], 0  ;;  %s189_s9 = smov [#allocation2]  }
   0x2   :  { %s15_s10 = sshll.u32 %s189_s9, 4  ;;  %s16_s10 = int_to_ptr.vmem [resolvable:$true] %s15_s10 }
   0x3   :  { %s153_s11 = scalar_lea.vmem %s16_s10, 512  ;;  %p158_p1 = scmp.lt.s32.totalorder %s16_s10, %s16_s10 }
   0x4   :  { %p154_p0 = scmp.ne.s32.totalorder %s16_s10, %s153_s11  ;;  %p159_p2 = scmp.lt.s32.totalorder %s153_s11, %s153_s11 }
   0x6   :  { %p160_p3 = por %p159_p2, %p158_p1 }
   0x8   :  { %p161_p4 = pnand %p160_p3, %p154_p0 }
   0xa   :  { %164 = shalt.err (!%p161_p4)
}
   0xb   :  { %s190_s12 = smov 128   ;;  %s191_s13 = smov 8  }
   0xc   :  { %21 = dma.hbm_to_vmem [thread:$0]  %s241_s0, 512, %s16_s10, [#allocation3], %s190_s12, %s190_s12, %s191_s13  }
   0xd   :  { %185 = dma.done.wait [#allocation3], 512  }
   0xe   :  { %186 = vsyncadd [#allocation3], 4294966784  ;;  %vm41_vm0 = vcmask 7168   ;;  %v192_v0 = vmov 1.0   ;;  %v25_v1 = vld [vmem:[#allocation2] sm:$0xff]  ;;  %v26_v2 = vld [vmem:[#allocation2 + $0x8] sm:$0xff] }
   0xf   :  { %42 = vst.msk [vmem:[%s243_s2] sm:$0xff] %vm41_vm0, %v192_v0  ;;  %43 = vst.msk [vmem:[%s243_s2 + $0x8] sm:$0xff] %vm41_vm0, %v192_v0  ;;  %v27_v3 = vld [vmem:[#allocation2 + $0x10] sm:$0xff]  ;;  %v106_v4 = vand.u32 2147483647, %v25_v1  ;;  %v108_v5 = vcvt.f32.s32 %v25_v1  ;;  %v116_v7 = vcvt.f32.s32 %v26_v2  ;;  %v28_v8 = vld [vmem:[#allocation2 + $0x18] sm:$0xff] }
  0x10   :  { %44 = vst.msk [vmem:[%s243_s2 + $0x10] sm:$0xff] %vm41_vm0, %v192_v0  ;;  %45 = vst.msk [vmem:[%s243_s2 + $0x18] sm:$0xff] %vm41_vm0, %v192_v0  ;;  %v114_v6 = vand.u32 2147483647, %v26_v2  ;;  %v124_v9 = vcvt.f32.s32 %v27_v3  ;;  %v111_v11 = vand.u32 2147483648, %v25_v1  ;;  %v119_v14 = vand.u32 2147483648, %v26_v2 }
  0x11   :  { %v109_v10 = vcvt.s32.f32 %v108_v5  ;;  %v122_v12 = vand.u32 2147483647, %v27_v3  ;;  %v117_v13 = vcvt.s32.f32 %v116_v7  ;;  %v127_v16 = vand.u32 2147483648, %v27_v3  ;;  %s193_s0 = smov [#allocation5]  }
  0x12   :  { %v125_v15 = vcvt.s32.f32 %v124_v9  ;;  %vm226_vm1 = vcmp.lt.f32.partialorder %v106_v4, 8388608.0  ;;  %vm230_vm2 = vcmp.lt.f32.partialorder %v114_v6, 8388608.0  ;;  %v132_v20 = vcvt.f32.s32 %v28_v8  ;;  %s71_s2 = sshll.u32 %s193_s0, 4  ;;  %s72_s2 = int_to_ptr.vmem [resolvable:$true] %s71_s2 }
  0x13   :  { %v110_v18 = vand.u32 2147483647, %v109_v10  ;;  %v118_v21 = vand.u32 2147483647, %v117_v13  ;;  %v130_v23 = vand.u32 2147483647, %v28_v8  ;;  %p170_p6 = scmp.lt.s32.totalorder %s72_s2, %s72_s2 }
  0x14   :  { %v126_v22 = vand.u32 2147483647, %v125_v15  ;;  %vm123_vm3 = vcmp.lt.f32.partialorder %v122_v12, 8388608.0  ;;  %v133_v25 = vcvt.s32.f32 %v132_v20  ;;  %v135_v26 = vand.u32 2147483648, %v28_v8  ;;  %s165_s24 = scalar_lea.vmem %s72_s2, 256 }
  0x15   :  { %v112_v24 = vor.u32 %v111_v11, %v110_v18  ;;  %v120_v27 = vor.u32 %v119_v14, %v118_v21  ;;  %vm131_vm4 = vcmp.lt.f32.partialorder %v130_v23, 8388608.0  ;;  %p166_p5 = scmp.ne.s32.totalorder %s72_s2, %s165_s24  ;;  %p171_p7 = scmp.lt.s32.totalorder %s165_s24, %s165_s24 }
  0x16   :  { %v128_v28 = vor.u32 %v127_v16, %v126_v22  ;;  %v134_v30 = vand.u32 2147483647, %v133_v25 }
  0x17   :  { %v113_v29 = vsel %vm226_vm1, %v112_v24, %v25_v1  ;;  %v121_v31 = vsel %vm230_vm2, %v120_v27, %v26_v2  ;;  %p172_p8 = por %p171_p7, %p170_p6 }
  0x18   :  { %v33_v32 = vmax.f32 %v113_v29, -128.0  ;;  %v129_v33 = vsel %vm123_vm3, %v128_v28, %v27_v3  ;;  %v34_v34 = vmax.f32 %v121_v31, -128.0  ;;  %v136_v35 = vor.u32 %v135_v26, %v134_v30 }
  0x19   :  { %v35_v36 = vmax.f32 %v129_v33, -128.0  ;;  %p173_p9 = pnand %p172_p8, %p166_p5 }
  0x1a   :  { %v37_v37 = vmin.f32 %v33_v32, 127.0  ;;  %v38_v38 = vmin.f32 %v34_v34, 127.0  ;;  %v137_v39 = vsel %vm131_vm4, %v136_v35, %v28_v8 }
  0x1b   :  { %v36_v40 = vmax.f32 %v137_v39, -128.0  ;;  %v39_v41 = vmin.f32 %v35_v36, 127.0 }
  0x1c   :  { %v98_v42 = vpack.c.bf16 %v38_v38, %v37_v37 }
  0x1d   :  { %v40_v43 = vmin.f32 %v36_v40, 127.0 }
  0x1e   :  { %99 = vst [vmem:[#allocation5] sm:$0xff] %v98_v42  }
  0x1f   :  { %v103_v44 = vpack.c.bf16 %v40_v43, %v39_v41 }
  0x21   :  { %105 = vst [vmem:[#allocation5 + $0x8] sm:$0xff] %v103_v44  }
  0x22   :  { %176 = shalt.err (!%p173_p9)
}
  0x23   :  { %s194_s25 = smov 64   ;;  %s195_s26 = smov 4  }
  0x24   :  { %77 = dma.vmem_to_hbm [thread:$0]  %s72_s2, 256, %s242_s1, [#allocation4], %s194_s25, %s194_s25, %s195_s26  }
  0x25   :  { %187 = dma.done.wait [#allocation4], 256  }
  0x26   :  { %188 = vsyncadd [#allocation4], 4294967040 }
  0x27   :  { %85 = vsyncpa [#allocation3], 1 }
  0x28   :  { %86 = vsyncpa [#allocation4], 1 }

</bundles_post_ra>
